<compile_context>
chip_gen: v7x
topology: tpu7x:2x2x1
jax: 0.10.0
libtpu: 0.0.40
codegen_flags: <defaults>
</compile_context>

<pallas_src>
import jax
import jax.numpy as jnp
from jax.experimental import pallas as pl
from jax.experimental.pallas import tpu as pltpu


S_SCALE = 30.0
NORM_EPS = 1e-12  # F.normalize default eps


def _round_up(x, m):
    return ((x + m - 1) // m) * m


def _vmem_limit_bytes():
    """~75% of physical VMEM (leaves compiler headroom on v7x's 64 MiB)."""
    try:
        cap = int(pltpu.get_tpu_info().vmem_capacity_bytes)
    except Exception:
        cap = 64 * 1024 * 1024  # conservative (v7x physical size)
    return (cap * 3) // 4


def normed_linear_kernel(x_ref, w_ref, rowinv_ref, colinv_ref, o_ref, *scratch):
    """Grid = (i batch tiles, j out-feature tiles, k in-feature tiles).

    x_ref / w_ref hold bf16 MXU operands; rowinv/colinv are small f32 vectors.
    For f32 outputs we accumulate directly into the resident o_ref block
    (no scratch); otherwise scratch[0] is a dedicated f32 accumulator.
    """
    acc_ref = scratch[0] if scratch else o_ref
    k = pl.program_id(2)

    @pl.when(k == 0)
    def _():
        acc_ref[...] = jnp.zeros_like(acc_ref)

    acc_ref[...] += jnp.dot(x_ref[...], w_ref[...],
                            preferred_element_type=jnp.float32)

    @pl.when(k == pl.num_programs(2) - 1)
    def _():
        scaled = S_SCALE * acc_ref[...] * rowinv_ref[...] * colinv_ref[...]
        o_ref[...] = scaled.astype(o_ref.dtype)


def normed_linear(x, weight, *, tm=512, tn=512, tk=1024,
                  mxu_dtype=jnp.bfloat16, out_dtype=None):
    """x: (B, Fin), weight: (Fin, Fout) -> (B, Fout)."""
    B, Fin = x.shape
    Fin_w, Fout = weight.shape
    assert Fin == Fin_w
    out_dtype = jnp.dtype(x.dtype if out_dtype is None else out_dtype)

    # Normalization folded into diagonal scaling, computed once in f32 in the
    # wrapper so F.normalize semantics are preserved despite bf16 MXU operands.
    x32 = x.astype(jnp.float32)
    w32 = weight.astype(jnp.float32)
    row_inv = 1.0 / jnp.maximum(
        jnp.sqrt(jnp.sum(x32 * x32, axis=1, keepdims=True)), NORM_EPS)   # (B, 1)
    col_inv = 1.0 / jnp.maximum(
        jnp.sqrt(jnp.sum(w32 * w32, axis=0, keepdims=True)), NORM_EPS)   # (1, Fout)

    # Tile clamping: 16-sublane alignment for bf16 operands, tn/tk kept
    # 256-aligned for the v6e/v7x 2x256x256 MXU (128 suffices on v5e).
    sub = 16 if jnp.dtype(mxu_dtype).itemsize == 2 else 8
    tm = _round_up(min(tm, _round_up(B, sub)), sub)
    tn = _round_up(min(tn, _round_up(Fout, 256)), 128)
    tk = _round_up(min(tk, _round_up(Fin, 256)), 128)

    Bp = _round_up(B, tm)
    Fip = _round_up(Fin, tk)
    Fop = _round_up(Fout, tn)

    # Stage MXU operands in bf16 (halves operand DMA bytes), zero-pad to tile
    # multiples so every block satisfies the (8/16, 128) layout rule.
    x_op = x.astype(mxu_dtype)
    w_op = weight.astype(mxu_dtype)
    if (Bp, Fip) != (B, Fin):
        x_op = jnp.pad(x_op, ((0, Bp - B), (0, Fip - Fin)))
    if (Fip, Fop) != (Fin, Fout):
        w_op = jnp.pad(w_op, ((0, Fip - Fin), (0, Fop - Fout)))
    riv = row_inv if Bp == B else jnp.pad(row_inv, ((0, Bp - B), (0, 0)))
    civ = col_inv if Fop == Fout else jnp.pad(col_inv, ((0, 0), (0, Fop - Fout)))

    grid = (Bp // tm, Fop // tn, Fip // tk)

    # f32 output: accumulate directly into the resident output block.
    # 16-bit output: use a dedicated f32 accumulator scratch.
    scratch_shapes = ([] if out_dtype == jnp.float32
                      else [pltpu.VMEM((tm, tn), jnp.float32)])

    op_elt = jnp.dtype(mxu_dtype).itemsize
    out_elt = out_dtype.itemsize
    # Honest HBM traffic: x is re-streamed grid_j times, W re-streamed grid_i
    # times, output written once, plus the two small norm vectors.
    bytes_accessed = (Bp * Fip * op_elt * grid[1]
                      + Fip * Fop * op_elt * grid[0]
                      + Bp * Fop * out_elt
                      + (Bp + Fop) * 4)

    out = pl.pallas_call(
        normed_linear_kernel,
        out_shape=jax.ShapeDtypeStruct((Bp, Fop), out_dtype),
        grid_spec=pltpu.PrefetchScalarGridSpec(
            num_scalar_prefetch=0,
            grid=grid,
            in_specs=[
                pl.BlockSpec((tm, tk), lambda i, j, k: (i, k)),   # x tile (bf16)
                pl.BlockSpec((tk, tn), lambda i, j, k: (k, j)),   # W tile (bf16)
                pl.BlockSpec((tm, 1), lambda i, j, k: (i, 0)),    # row inverse norms
                pl.BlockSpec((1, tn), lambda i, j, k: (0, j)),    # col inverse norms
            ],
            out_specs=pl.BlockSpec((tm, tn), lambda i, j, k: (i, j)),
            scratch_shapes=scratch_shapes,
        ),
        compiler_params=pltpu.CompilerParams(
            # TODO(synk): on v7x (2 TCs/chip) consider pltpu.CORE_PARALLEL on
            # the i axis; plain strings kept for single-TC v5e/v6e portability.
            dimension_semantics=("parallel", "parallel", "arbitrary"),
            vmem_limit_bytes=_vmem_limit_bytes(),
        ),
        cost_estimate=pl.CostEstimate(
            flops=2 * Bp * Fip * Fop,
            transcendentals=0,
            bytes_accessed=bytes_accessed,
        ),
    )(x_op, w_op, riv, civ)

    return out[:B, :Fout]


def init_normed_linear_weight(key, in_features, out_features):
    """Tensor(in, out).uniform_(-1, 1).renorm_(2, 1, 1e-5).mul_(1e5):
    each column rescaled to L2 norm <= 1e-5, then *1e5 -> ~unit-norm columns."""
    w = jax.random.uniform(key, (in_features, out_features),
                           dtype=jnp.float32, minval=-1.0, maxval=1.0)
    col_norm = jnp.sqrt(jnp.sum(w * w, axis=0, keepdims=True))
    maxnorm = 1e-5
    scale = jnp.where(col_norm > maxnorm, maxnorm / (col_norm + 1e-7), 1.0)
    return w * scale * 1e5


def normed_linear_ref(x, weight, mxu_dtype=None):
    """Pure-JAX reference. mxu_dtype=None -> exact f32 matmul;
    otherwise simulate the kernel's reduced-precision MXU matmul."""
    x32 = x.astype(jnp.float32)
    w32 = weight.astype(jnp.float32)
    row_inv = 1.0 / jnp.maximum(
        jnp.sqrt(jnp.sum(x32 * x32, axis=1, keepdims=True)), NORM_EPS)
    col_inv = 1.0 / jnp.maximum(
        jnp.sqrt(jnp.sum(w32 * w32, axis=0, keepdims=True)), NORM_EPS)
    if mxu_dtype is None:
        prod = x32 @ w32
    else:
        prod = jnp.dot(x.astype(mxu_dtype), weight.astype(mxu_dtype),
                       preferred_element_type=jnp.float32)
    return S_SCALE * prod * row_inv * col_inv


if __name__ == "__main__":
    key = jax.random.PRNGKey(0)
    k_w, k_x = jax.random.split(key)

    batch = 64
    in_features = 256
    out_features = 128

    weight = init_normed_linear_weight(k_w, in_features, out_features)
    x = jax.random.normal(k_x, (batch, in_features), dtype=jnp.float32)

    # Default (large-tile) path: tiles clamp to the whole padded problem,
    # f32 output accumulates directly in the resident o_ref block (no scratch).
    out = jax.block_until_ready(normed_linear(x, weight))
    # Small explicit tiles: exercises multi-step K accumulation + re-streaming.
    out_tiled = jax.block_until_ready(
        normed_linear(x, weight, tm=32, tn=128, tk=128))
    # bf16 output: exercises the dedicated f32 accumulator-scratch path.
    out_bf16 = jax.block_until_ready(
        normed_linear(x, weight, out_dtype=jnp.bfloat16))

    ref_f32 = normed_linear_ref(x, weight)                           # exact
    ref_bf16 = normed_linear_ref(x, weight, mxu_dtype=jnp.bfloat16)  # same MXU math

    assert out.shape == (batch, out_features)
    assert out_tiled.shape == (batch, out_features)
    assert out_bf16.shape == (batch, out_features) and out_bf16.dtype == jnp.bfloat16

    # Tight check against a reference using the same bf16 MXU arithmetic.
    err_b = float(jnp.max(jnp.abs(out - ref_bf16)))
    err_t = float(jnp.max(jnp.abs(out_tiled - ref_bf16)))
    assert jnp.allclose(out, ref_bf16, atol=2e-3, rtol=2e-3), f"bf16-ref err {err_b}"
    assert jnp.allclose(out_tiled, ref_bf16, atol=2e-3, rtol=2e-3), f"bf16-ref err {err_t}"

    # bf16-output path: extra output-rounding tolerance only.
    err_o = float(jnp.max(jnp.abs(out_bf16.astype(jnp.float32) - ref_bf16)))
    assert jnp.allclose(out_bf16.astype(jnp.float32), ref_bf16,
                        atol=2e-1, rtol=2e-2), f"bf16-out err {err_o}"

    # Loose check against the exact f32 PyTorch-equivalent reference
    # (difference is bf16 MXU operand rounding only).
    err_f = float(jnp.max(jnp.abs(out - ref_f32)))
    assert jnp.allclose(out, ref_f32, atol=8e-2, rtol=5e-2), f"f32-ref err {err_f}"

    print("KERNEL_OK")
</pallas_src>

<mosaic_0001>
module attributes {stable_mosaic.version = 11 : i64} {
  func.func @normed_linear_kernel(%arg0: i32, %arg1: i32, %arg2: i32, %arg3: memref<64x256xbf16, #tpu.memory_space<vmem>>, %arg4: memref<256x256xbf16, #tpu.memory_space<vmem>>, %arg5: memref<64x1xf32, #tpu.memory_space<vmem>>, %arg6: memref<1x256xf32, #tpu.memory_space<vmem>>, %arg7: memref<64x256xf32, #tpu.memory_space<vmem>>) attributes {dimension_semantics = [#tpu.dimension_semantics<parallel>, #tpu.dimension_semantics<parallel>, #tpu.dimension_semantics<arbitrary>], iteration_bounds = array<i64: 1, 1, 1>, scalar_prefetch = 0 : i64, scratch_operands = 0 : i64, tpu.core_type = #tpu.core_type<tc>, window_params = [{transform_indices = @transform_0, window_bounds = array<i64: 64, 256>}, {transform_indices = @transform_1, window_bounds = array<i64: 256, 256>}, {transform_indices = @transform_2, window_bounds = array<i64: 64, 1>}, {transform_indices = @transform_3, window_bounds = array<i64: 1, 256>}, {transform_indices = @transform_4, window_bounds = array<i64: 64, 256>}]} {
    %c0_i32 = arith.constant 0 : i32
    %0 = arith.cmpi eq, %arg2, %c0_i32 : i32
    %1 = arith.extui %0 : i1 to i32
    %c0_i32_0 = arith.constant 0 : i32
    %2 = arith.cmpi ne, %1, %c0_i32_0 : i32
    scf.if %2 {
      %cst_10 = arith.constant 0.000000e+00 : f32
      %12 = vector.broadcast %cst_10 : f32 to vector<64x256xf32>
      %c0_11 = arith.constant 0 : index
      %c0_12 = arith.constant 0 : index
      %13 = vector.load %arg7[%c0_11, %c0_12] : memref<64x256xf32, #tpu.memory_space<vmem>>, vector<64x256xf32>
      tpu.vector_store %arg7[%c0_11, %c0_12], %12 {strides = array<i32>} : memref<64x256xf32, #tpu.memory_space<vmem>>, vector<64x256xf32>,
    } else {
    }
    %c0 = arith.constant 0 : index
    %c0_1 = arith.constant 0 : index
    %3 = vector.load %arg7[%c0, %c0_1] : memref<64x256xf32, #tpu.memory_space<vmem>>, vector<64x256xf32>
    %c0_2 = arith.constant 0 : index
    %c0_3 = arith.constant 0 : index
    %4 = vector.load %arg3[%c0_2, %c0_3] : memref<64x256xbf16, #tpu.memory_space<vmem>>, vector<64x256xbf16>
    %c0_4 = arith.constant 0 : index
    %c0_5 = arith.constant 0 : index
    %5 = vector.load %arg4[%c0_4, %c0_5] : memref<256x256xbf16, #tpu.memory_space<vmem>>, vector<256x256xbf16>
    %cst = arith.constant dense<0.000000e+00> : vector<64x256xf32>
    %6 = tpu.matmul %4, %5, %cst {dimension_numbers = #tpu.dot_dimension_numbers<[1], [0], [0], [1], [0, 0, 1, 1], [], []>} : vector<64x256xbf16>, vector<256x256xbf16>, vector<64x256xf32> -> vector<64x256xf32>
    %7 = arith.addf %3, %6 : vector<64x256xf32>
    %c0_6 = arith.constant 0 : index
    %c0_7 = arith.constant 0 : index
    %8 = vector.load %arg7[%c0_6, %c0_7] : memref<64x256xf32, #tpu.memory_space<vmem>>, vector<64x256xf32>
    tpu.vector_store %arg7[%c0_6, %c0_7], %7 {strides = array<i32>} : memref<64x256xf32, #tpu.memory_space<vmem>>, vector<64x256xf32>,
    %c0_i32_8 = arith.constant 0 : i32
    %9 = arith.cmpi eq, %arg2, %c0_i32_8 : i32
    %10 = arith.extui %9 : i1 to i32
    %c0_i32_9 = arith.constant 0 : i32
    %11 = arith.cmpi ne, %10, %c0_i32_9 : i32
    scf.if %11 {
      %c0_10 = arith.constant 0 : index
      %c0_11 = arith.constant 0 : index
      %12 = vector.load %arg7[%c0_10, %c0_11] : memref<64x256xf32, #tpu.memory_space<vmem>>, vector<64x256xf32>
      %cst_12 = arith.constant 3.000000e+01 : f32
      %13 = vector.broadcast %cst_12 : f32 to vector<64x256xf32>
      %14 = arith.mulf %13, %12 : vector<64x256xf32>
      %c0_13 = arith.constant 0 : index
      %c0_14 = arith.constant 0 : index
      %15 = vector.load %arg5[%c0_13, %c0_14] : memref<64x1xf32, #tpu.memory_space<vmem>>, vector<64x1xf32>
      %16 = vector.broadcast %15 : vector<64x1xf32> to vector<64x256xf32>
      %17 = arith.mulf %14, %16 : vector<64x256xf32>
      %c0_15 = arith.constant 0 : index
      %c0_16 = arith.constant 0 : index
      %18 = vector.load %arg6[%c0_15, %c0_16] : memref<1x256xf32, #tpu.memory_space<vmem>>, vector<1x256xf32>
      %19 = vector.broadcast %18 : vector<1x256xf32> to vector<64x256xf32>
      %20 = arith.mulf %17, %19 : vector<64x256xf32>
      %c0_17 = arith.constant 0 : index
      %c0_18 = arith.constant 0 : index
      %21 = vector.load %arg7[%c0_17, %c0_18] : memref<64x256xf32, #tpu.memory_space<vmem>>, vector<64x256xf32>
      tpu.vector_store %arg7[%c0_17, %c0_18], %20 {strides = array<i32>} : memref<64x256xf32, #tpu.memory_space<vmem>>, vector<64x256xf32>,
    } else {
    }
    return
  }
  func.func @transform_0(%arg0: i32, %arg1: i32, %arg2: i32) -> (i32, i32) {
    %c0_i32 = arith.constant 0 : i32
    return %arg0, %arg2 : i32, i32
  }
  func.func @transform_1(%arg0: i32, %arg1: i32, %arg2: i32) -> (i32, i32) {
    %c0_i32 = arith.constant 0 : i32
    return %arg2, %arg1 : i32, i32
  }
  func.func @transform_2(%arg0: i32, %arg1: i32, %arg2: i32) -> (i32, i32) {
    %c0_i32 = arith.constant 0 : i32
    %c0_i32_0 = arith.constant 0 : i32
    return %arg0, %c0_i32 : i32, i32
  }
  func.func @transform_3(%arg0: i32, %arg1: i32, %arg2: i32) -> (i32, i32) {
    %c0_i32 = arith.constant 0 : i32
    %c0_i32_0 = arith.constant 0 : i32
    return %c0_i32, %arg1 : i32, i32
  }
  func.func @transform_4(%arg0: i32, %arg1: i32, %arg2: i32) -> (i32, i32) {
    %c0_i32 = arith.constant 0 : i32
    return %arg0, %arg1 : i32, i32
  }
}

</mosaic_0001>

<bundles_post_ra>
// kernel: tpu_custom_call.1
= control target key start
LH: loop header
LB: loop body
LE: loop exit
PB: predicated region body
PF: predicated region fallthrough
CT: control target
= control target key end

     0   :  { %9 = vsyncpa [#allocation3], 0  ;;  %s898_s0 = inlined_call_operand.vmem [shape: bf16[64,256], index: 0, kind: input, shape index: {}]   ;;  %s899_s1 = inlined_call_operand.hbm [shape: bf16[256,256], index: 1, kind: input, shape index: {}]   ;;  %s900_s2 = inlined_call_operand.vmem [shape: f32[64,1], index: 2, kind: input, shape index: {}]   ;;  %s901_s3 = inlined_call_operand.vmem [shape: f32[1,256], index: 3, kind: input, shape index: {}]   ;;  %s902_s4 = inlined_call_operand.hbm [shape: f32[64,256], index: 4, kind: output, shape index: {}]  }
   0x1   :  { %10 = vsyncpa [#allocation4], 0  ;;  %s763_s15 = smov [#allocation2]   ;;  %s715_s19 = scalar_lea.hbm %s899_s1, 4096 }
   0x2   :  { %s18_s16 = sshll.u32 %s763_s15, 4  ;;  %p716_p0 = scmp.ne.s32.totalorder %s899_s1, %s715_s19  ;;  %s19_s16 = int_to_ptr.vmem [resolvable:$true] %s18_s16 }
   0x3   :  { %p719_p1 = scmp.lt.u32.totalorder %s715_s19, %s899_s1 }
   0x5   :  { %p721_p2 = pnand %p719_p1, %p716_p0 }
   0x7   :  { %724 = shalt.err (!%p721_p2)
}
   0x8   :  { %s725_s24 = scalar_lea.vmem %s19_s16, 4096  ;;  %p730_p4 = scmp.lt.s32.totalorder %s19_s16, %s19_s16 }
   0x9   :  { %p726_p3 = scmp.ne.s32.totalorder %s19_s16, %s725_s24  ;;  %p731_p5 = scmp.lt.s32.totalorder %s725_s24, %s725_s24 }
   0xb   :  { %p732_p6 = por %p731_p5, %p730_p4 }
   0xd   :  { %p733_p7 = pnand %p732_p6, %p726_p3 }
   0xf   :  { %736 = shalt.err (!%p733_p7)
}
  0x10   :  { %s764_s25 = smov 128   ;;  %s765_s26 = smov 8  }
  0x11   :  { %24 = dma.hbm_to_vmem [thread:$0]  %s899_s1, 4096, %s19_s16, [#allocation3], %s764_s25, %s764_s25, %s765_s26  }
  0x12   :  { %759 = dma.done.wait [#allocation3], 4096  }
  0x13   :  { %760 = vsyncadd [#allocation3], 4294963200  ;;  %v766_v0 = vmov 0   ;;  %v655_v1 = vld [vmem:[#allocation2 + $0x4] ss:$8 sps:$4 sm:$0xff]   ;;  %v450_v18 = vld [vmem:[%s900_s2 + $0x10] sm:$0xff]  ;;  %v514_v49 = vlaneseq }
  0x14   :  { %654 = vset.pattern.permute.xlu1 %v766_v0  ;;  %653 = vset.pattern.permute.xlu0 %v766_v0  ;;  %v657_v2 = vld [vmem:[#allocation2] ss:$8 sps:$4 sm:$0xff]   ;;  %v658_v3 = vld [vmem:[#allocation2 + $0x14] ss:$8 sps:$4 sm:$0xff]   ;;  %v660_v4 = vld [vmem:[#allocation2 + $0x10] ss:$8 sps:$4 sm:$0xff]  }
  0x15   :  { %308 = vmatprep.subr.bf16.mxu0 %v655_v1  ;;  %613 = vmatprep.subr.bf16.mxu1 %v655_v1  ;;  %v661_v5 = vld [vmem:[#allocation2 + $0x24] ss:$8 sps:$4 sm:$0xff]   ;;  %v663_v6 = vld [vmem:[#allocation2 + $0x20] ss:$8 sps:$4 sm:$0xff]   ;;  %v664_v7 = vld [vmem:[#allocation2 + $0x34] ss:$8 sps:$4 sm:$0xff]  }
  0x16   :  { %309 = vmatpush1.bf16.msra.mxu0 %v657_v2  ;;  %629 = vmatpush1.bf16.msra.mxu1 %v657_v2  ;;  %v666_v8 = vld [vmem:[#allocation2 + $0x30] ss:$8 sps:$4 sm:$0xff]   ;;  %v667_v9 = vld [vmem:[#allocation2 + $0x44] ss:$8 sps:$4 sm:$0xff]   ;;  %v669_v10 = vld [vmem:[#allocation2 + $0x40] ss:$8 sps:$4 sm:$0xff]  }
  0x17   :  { %310 = vmatprep.subr.bf16.mxu0 %v658_v3  ;;  %614 = vmatprep.subr.bf16.mxu1 %v658_v3  ;;  %v670_v11 = vld [vmem:[#allocation2 + $0x54] ss:$8 sps:$4 sm:$0xff]   ;;  %v672_v12 = vld [vmem:[#allocation2 + $0x50] ss:$8 sps:$4 sm:$0xff]   ;;  %v673_v13 = vld [vmem:[#allocation2 + $0x64] ss:$8 sps:$4 sm:$0xff]  }
  0x18   :  { %v705_v14 = vld [vmem:[%s898_s0 + $0x4] ss:$8 sps:$4 sm:$0xff]   ;;  %v675_v15 = vld [vmem:[#allocation2 + $0x60] ss:$8 sps:$4 sm:$0xff]   ;;  %v676_v17 = vld [vmem:[#allocation2 + $0x74] ss:$8 sps:$4 sm:$0xff]   ;;  %468 = vperm.xlu1 %654, %v450_v18  }
  0x19   :  { %v708_v16 = vld [vmem:[%s898_s0 + $0x24] ss:$8 sps:$4 sm:$0xff]   ;;  %340 = vmatprep.mubr.bf16.mxu0 %v705_v14  ;;  %v678_v19 = vld [vmem:[#allocation2 + $0x70] ss:$8 sps:$4 sm:$0xff]   ;;  %v681_v24 = vld [vmem:[#allocation2 + $0x80] ss:$8 sps:$4 sm:$0xff]  }
  0x1a   :  { %311 = vmatpush1.bf16.msra.mxu0 %v660_v4  ;;  %630 = vmatpush1.bf16.msra.mxu1 %v660_v4  ;;  %v448_v20 = vld [vmem:[%s900_s2] sm:$0xff]  ;;  %v451_v22 = vld [vmem:[%s900_s2 + $0x18] sm:$0xff]  ;;  %v449_v23 = vld [vmem:[%s900_s2 + $0x8] sm:$0xff]  ;;  %v515_v52 = vshrl.u32 %v514_v49, 7 }
  0x1b   :  { %312 = vmatprep.subr.bf16.mxu0 %v661_v5  ;;  %615 = vmatprep.subr.bf16.mxu1 %v661_v5  ;;  %v679_v21 = vld [vmem:[#allocation2 + $0x84] ss:$8 sps:$4 sm:$0xff]   ;;  %v682_v25 = vld [vmem:[#allocation2 + $0x94] ss:$8 sps:$4 sm:$0xff]   ;;  %v684_v28 = vld [vmem:[#allocation2 + $0x90] ss:$8 sps:$4 sm:$0xff]  }
  0x1c   :  { %360 = vmatprep.mubr.bf16.mxu1 %v708_v16  ;;  %458 = vperm.xlu0 %653, %v448_v20   ;;  %v453_v26 = vld [vmem:[%s900_s2 + $0x28] sm:$0xff]  ;;  %v452_v27 = vld [vmem:[%s900_s2 + $0x20] sm:$0xff]  ;;  %v455_v30 = vld [vmem:[%s900_s2 + $0x38] sm:$0xff]  ;;  %v516_v53 = vsub.s32 0, %v515_v52  ;;  %v520_v54 = vsub.s32 1, %v515_v52 }
  0x1d   :  { %473 = vperm.xlu1 %654, %v451_v22   ;;  %v685_v29 = vld [vmem:[#allocation2 + $0xa4] ss:$8 sps:$4 sm:$0xff]   ;;  %v454_v31 = vld [vmem:[%s900_s2 + $0x30] sm:$0xff]  ;;  %v687_v32 = vld [vmem:[#allocation2 + $0xa0] ss:$8 sps:$4 sm:$0xff]  }
  0x1e   :  { %313 = vmatpush1.bf16.msra.mxu0 %v663_v6  ;;  %631 = vmatpush1.bf16.msra.mxu1 %v663_v6  ;;  %v688_v33 = vld [vmem:[#allocation2 + $0xb4] ss:$8 sps:$4 sm:$0xff]   ;;  %v690_v34 = vld [vmem:[#allocation2 + $0xb0] ss:$8 sps:$4 sm:$0xff]   ;;  %v691_v35 = vld [vmem:[#allocation2 + $0xc4] ss:$8 sps:$4 sm:$0xff]  }
  0x1f   :  { %314 = vmatprep.subr.bf16.mxu0 %v664_v7  ;;  %616 = vmatprep.subr.bf16.mxu1 %v664_v7  ;;  %v693_v36 = vld [vmem:[#allocation2 + $0xc0] ss:$8 sps:$4 sm:$0xff]   ;;  %v694_v37 = vld [vmem:[#allocation2 + $0xd4] ss:$8 sps:$4 sm:$0xff]   ;;  %v696_v38 = vld [vmem:[#allocation2 + $0xd0] ss:$8 sps:$4 sm:$0xff]  }
  0x20   :  { %463 = vperm.xlu0 %653, %v449_v23   ;;  %v697_v39 = vld [vmem:[#allocation2 + $0xe4] ss:$8 sps:$4 sm:$0xff]   ;;  %v699_v40 = vld [vmem:[#allocation2 + $0xe0] ss:$8 sps:$4 sm:$0xff]   ;;  %v700_v41 = vld [vmem:[#allocation2 + $0xf4] ss:$8 sps:$4 sm:$0xff]  }
  0x21   :  { %483 = vperm.xlu1 %654, %v453_v26   ;;  %v702_v42 = vld [vmem:[#allocation2 + $0xf0] ss:$8 sps:$4 sm:$0xff]   ;;  %v703_v43 = vld [vmem:[%s898_s0] ss:$8 sps:$4 sm:$0xff]   ;;  %v709_v45 = vld [vmem:[%s898_s0 + $0x14] ss:$8 sps:$4 sm:$0xff]  }
  0x22   :  { %315 = vmatpush1.bf16.msra.mxu0 %v666_v8  ;;  %632 = vmatpush1.bf16.msra.mxu1 %v666_v8  ;;  %v706_v44 = vld [vmem:[%s898_s0 + $0x20] ss:$8 sps:$4 sm:$0xff]   ;;  %v711_v46 = vld [vmem:[%s898_s0 + $0x34] ss:$8 sps:$4 sm:$0xff]   ;;  %v713_v47 = vld [vmem:[%s898_s0 + $0x10] ss:$8 sps:$4 sm:$0xff]  }
  0x23   :  { %316 = vmatprep.subr.bf16.mxu0 %v667_v9  ;;  %617 = vmatprep.subr.bf16.mxu1 %v667_v9  ;;  %v714_v48 = vld [vmem:[%s898_s0 + $0x30] ss:$8 sps:$4 sm:$0xff]   ;;  %v512_v56 = vld [vmem:[%s901_s3] sm:$0x3]  ;;  %s767_s0 = smov [#allocation5]  }
  0x24   :  { %478 = vperm.xlu0 %653, %v452_v27   ;;  %v862_v62 = vrot.slane %v512_v56, %v516_v53  ;;  %v864_v63 = vrot.slane %v512_v56, %v520_v54  ;;  %s561_s3 = sshll.u32 %s767_s0, 4  ;;  %s562_s3 = int_to_ptr.vmem [resolvable:$true] %s561_s3 }
  0x25   :  { %493 = vperm.xlu1 %654, %v455_v30   ;;  %s737_s8 = scalar_lea.vmem %s562_s3, 2048  ;;  %p742_p9 = scmp.lt.s32.totalorder %s562_s3, %s562_s3 }
  0x26   :  { %317 = vmatpush1.bf16.msra.mxu0 %v669_v10  ;;  %633 = vmatpush1.bf16.msra.mxu1 %v669_v10  ;;  %p738_p8 = scmp.ne.s32.totalorder %s562_s3, %s737_s8  ;;  %p743_p10 = scmp.lt.s32.totalorder %s737_s8, %s737_s8 }
  0x27   :  { %318 = vmatprep.subr.bf16.mxu0 %v670_v11  ;;  %618 = vmatprep.subr.bf16.mxu1 %v670_v11 }
  0x28   :  { %488 = vperm.xlu0 %653, %v454_v31   ;;  %p744_p11 = por %p743_p10, %p742_p9 }
  0x2a   :  { %319 = vmatpush1.bf16.msra.mxu0 %v672_v12  ;;  %634 = vmatpush1.bf16.msra.mxu1 %v672_v12  ;;  %p745_p12 = pnand %p744_p11, %p738_p8 }
  0x2b   :  { %320 = vmatprep.subr.bf16.mxu0 %v673_v13  ;;  %619 = vmatprep.subr.bf16.mxu1 %v673_v13 }
  0x2e   :  { %321 = vmatpush1.bf16.msra.mxu0 %v675_v15  ;;  %635 = vmatpush1.bf16.msra.mxu1 %v675_v15 }
  0x2f   :  { %322 = vmatprep.subr.bf16.mxu0 %v676_v17  ;;  %620 = vmatprep.subr.bf16.mxu1 %v676_v17 }
  0x32   :  { %323 = vmatpush1.bf16.msra.mxu0 %v678_v19  ;;  %636 = vmatpush1.bf16.msra.mxu1 %v678_v19 }
  0x33   :  { %324 = vmatprep.subr.bf16.mxu0 %v679_v21  ;;  %621 = vmatprep.subr.bf16.mxu1 %v679_v21 }
  0x36   :  { %325 = vmatpush1.bf16.msra.mxu0 %v681_v24  ;;  %637 = vmatpush1.bf16.msra.mxu1 %v681_v24 }
  0x37   :  { %326 = vmatprep.subr.bf16.mxu0 %v682_v25  ;;  %622 = vmatprep.subr.bf16.mxu1 %v682_v25 }
  0x3a   :  { %327 = vmatpush1.bf16.msra.mxu0 %v684_v28  ;;  %638 = vmatpush1.bf16.msra.mxu1 %v684_v28 }
  0x3b   :  { %328 = vmatprep.subr.bf16.mxu0 %v685_v29  ;;  %623 = vmatprep.subr.bf16.mxu1 %v685_v29 }
  0x3e   :  { %329 = vmatpush1.bf16.msra.mxu0 %v687_v32  ;;  %639 = vmatpush1.bf16.msra.mxu1 %v687_v32 }
  0x3f   :  { %330 = vmatprep.subr.bf16.mxu0 %v688_v33  ;;  %624 = vmatprep.subr.bf16.mxu1 %v688_v33 }
  0x42   :  { %331 = vmatpush1.bf16.msra.mxu0 %v690_v34  ;;  %640 = vmatpush1.bf16.msra.mxu1 %v690_v34 }
  0x43   :  { %332 = vmatprep.subr.bf16.mxu0 %v691_v35  ;;  %625 = vmatprep.subr.bf16.mxu1 %v691_v35 }
  0x46   :  { %333 = vmatpush1.bf16.msra.mxu0 %v693_v36  ;;  %641 = vmatpush1.bf16.msra.mxu1 %v693_v36 }
  0x47   :  { %334 = vmatprep.subr.bf16.mxu0 %v694_v37  ;;  %626 = vmatprep.subr.bf16.mxu1 %v694_v37 }
  0x4a   :  { %335 = vmatpush1.bf16.msra.mxu0 %v696_v38  ;;  %642 = vmatpush1.bf16.msra.mxu1 %v696_v38 }
  0x4b   :  { %336 = vmatprep.subr.bf16.mxu0 %v697_v39  ;;  %627 = vmatprep.subr.bf16.mxu1 %v697_v39 }
  0x4e   :  { %337 = vmatpush1.bf16.msra.mxu0 %v699_v40  ;;  %643 = vmatpush1.bf16.msra.mxu1 %v699_v40 }
  0x4f   :  { %338 = vmatprep.subr.bf16.mxu0 %v700_v41  ;;  %628 = vmatprep.subr.bf16.mxu1 %v700_v41 }
  0x52   :  { %339 = vmatpush1.bf16.msra.mxu0 %v702_v42  ;;  %644 = vmatpush1.bf16.msra.mxu1 %v702_v42 }
  0x55   :  { %341 = vmatmul.mubr.bf16.vlgmr.msra.gmra.mrb[0].mxu0 %v703_v43  ;;  %361 = vmatmul.mubr.bf16.vlgmr.msra.gmra.mrb[0].mxu1 %v706_v44 }
  0x56   :  { %350 = vmatprep.mubr.bf16.mxu0 %v709_v45  ;;  %370 = vmatprep.mubr.bf16.mxu1 %v711_v46 }
  0x5d   :  { %351 = vmatmul.mubr.bf16.gmra.mrb[4].mxu0 %v713_v47  ;;  %371 = vmatmul.mubr.bf16.gmra.mrb[4].mxu1 %v714_v48 }
  0x97   :  { %v855_v51 = vpop.permute.xlu1 %468 }
  0x9b   :  { %v459_v50 = vpop.permute.xlu0 %458 }
  0x9c   :  { %v860_v57 = vpop.permute.xlu1 %473 }
  0x9f   :  { %v464_v55 = vpop.permute.xlu0 %463 }
  0xa0   :  { %v484_v15 = vpop.permute.xlu1 %483 }
  0xa3   :  { %v479_v7 = vpop.permute.xlu0 %478 }
  0xa4   :  { %v494_v48 = vpop.permute.xlu1 %493 }
  0xa7   :  { %v489_v41 = vpop.permute.xlu0 %488 }
 0x128   :  { %v342_v58 = vpop.f32.mrb[0].mxu0  ;;  %v362_v59 = vpop.f32.mrb[0].mxu1 }
 0x129   :  { %v344_v60 = vpop.f32.mrb[1].mxu0  ;;  %v364_v61 = vpop.f32.mrb[1].mxu1  ;;  %v432_v2 = vmul.f32 30.0, %v342_v58  ;;  %v440_v5 = vmul.f32 30.0, %v362_v59 }
 0x12a   :  { %v346_v0 = vpop.f32.mrb[2].mxu0  ;;  %v366_v1 = vpop.f32.mrb[2].mxu1  ;;  %v433_v6 = vmul.f32 30.0, %v344_v60  ;;  %v441_v8 = vmul.f32 30.0, %v364_v61 }
 0x12b   :  { %v348_v3 = vpop.f32.mrb[3].mxu0  ;;  %v368_v4 = vpop.f32.mrb[3].mxu1  ;;  %v496_v9 = vmul.f32 %v459_v50, %v432_v2  ;;  %v434_v10 = vmul.f32 30.0, %v346_v0  ;;  %v442_v11 = vmul.f32 30.0, %v366_v1  ;;  %v504_v12 = vmul.f32 %v479_v7, %v440_v5 }
 0x12c   :  { %v497_v13 = vmul.f32 %v459_v50, %v433_v6  ;;  %v435_v14 = vmul.f32 30.0, %v348_v3  ;;  %v443_v16 = vmul.f32 30.0, %v368_v4  ;;  %v505_v17 = vmul.f32 %v479_v7, %v441_v8 }
 0x12d   :  { %v524_v18 = vmul.f32 %v862_v62, %v496_v9  ;;  %v498_v19 = vmul.f32 %v464_v55, %v434_v10  ;;  %v506_v20 = vmul.f32 %v484_v15, %v442_v11  ;;  %v532_v21 = vmul.f32 %v862_v62, %v504_v12 }
 0x12e   :  { %v525_v22 = vmul.f32 %v864_v63, %v497_v13  ;;  %v499_v23 = vmul.f32 %v464_v55, %v435_v14  ;;  %v507_v24 = vmul.f32 %v484_v15, %v443_v16  ;;  %v533_v25 = vmul.f32 %v864_v63, %v505_v17 }
 0x12f   :  { %540 = vst [vmem:[#allocation5] sm:$0xff] %v524_v18  ;;  %v526_v28 = vmul.f32 %v862_v62, %v498_v19  ;;  %v534_v29 = vmul.f32 %v862_v62, %v506_v20  ;;  %548 = vst [vmem:[#allocation5 + $0x40] sm:$0xff] %v532_v21 }
 0x130   :  { %v352_v26 = vpop.f32.mrb[4].mxu0  ;;  %v372_v27 = vpop.f32.mrb[4].mxu1  ;;  %541 = vst [vmem:[#allocation5 + $0x8] sm:$0xff] %v525_v22  ;;  %v527_v32 = vmul.f32 %v864_v63, %v499_v23  ;;  %v535_v33 = vmul.f32 %v864_v63, %v507_v24  ;;  %549 = vst [vmem:[#allocation5 + $0x48] sm:$0xff] %v533_v25 }
 0x131   :  { %v354_v30 = vpop.f32.mrb[5].mxu0  ;;  %v374_v31 = vpop.f32.mrb[5].mxu1  ;;  %542 = vst [vmem:[#allocation5 + $0x10] sm:$0xff] %v526_v28  ;;  %550 = vst [vmem:[#allocation5 + $0x50] sm:$0xff] %v534_v29  ;;  %v436_v36 = vmul.f32 30.0, %v352_v26  ;;  %v444_v37 = vmul.f32 30.0, %v372_v27 }
 0x132   :  { %v356_v34 = vpop.f32.mrb[6].mxu0  ;;  %v376_v35 = vpop.f32.mrb[6].mxu1  ;;  %543 = vst [vmem:[#allocation5 + $0x18] sm:$0xff] %v527_v32  ;;  %551 = vst [vmem:[#allocation5 + $0x58] sm:$0xff] %v535_v33  ;;  %v437_v40 = vmul.f32 30.0, %v354_v30  ;;  %v445_v42 = vmul.f32 30.0, %v374_v31 }
 0x133   :  { %v358_v38 = vpop.f32.mrb[7].mxu0  ;;  %v378_v39 = vpop.f32.mrb[7].mxu1  ;;  %v500_v43 = vmul.f32 %v855_v51, %v436_v36  ;;  %v438_v44 = vmul.f32 30.0, %v356_v34  ;;  %v446_v45 = vmul.f32 30.0, %v376_v35  ;;  %v508_v46 = vmul.f32 %v489_v41, %v444_v37 }
 0x134   :  { %v501_v47 = vmul.f32 %v855_v51, %v437_v40  ;;  %v509_v49 = vmul.f32 %v489_v41, %v445_v42  ;;  %v439_v50 = vmul.f32 30.0, %v358_v38  ;;  %v447_v52 = vmul.f32 30.0, %v378_v39 }
 0x135   :  { %v528_v53 = vmul.f32 %v862_v62, %v500_v43  ;;  %v502_v54 = vmul.f32 %v860_v57, %v438_v44  ;;  %v510_v55 = vmul.f32 %v494_v48, %v446_v45  ;;  %v536_v56 = vmul.f32 %v862_v62, %v508_v46 }
 0x136   :  { %v529_v58 = vmul.f32 %v864_v63, %v501_v47  ;;  %v537_v59 = vmul.f32 %v864_v63, %v509_v49  ;;  %v503_v60 = vmul.f32 %v860_v57, %v439_v50  ;;  %v511_v51 = vmul.f32 %v494_v48, %v447_v52 }
 0x137   :  { %544 = vst [vmem:[#allocation5 + $0x20] sm:$0xff] %v528_v53  ;;  %v530_v61 = vmul.f32 %v862_v62, %v502_v54  ;;  %v538_v0 = vmul.f32 %v862_v62, %v510_v55  ;;  %552 = vst [vmem:[#allocation5 + $0x60] sm:$0xff] %v536_v56 }
 0x138   :  { %545 = vst [vmem:[#allocation5 + $0x28] sm:$0xff] %v529_v58  ;;  %553 = vst [vmem:[#allocation5 + $0x68] sm:$0xff] %v537_v59  ;;  %v531_v1 = vmul.f32 %v864_v63, %v503_v60  ;;  %v539_v2 = vmul.f32 %v864_v63, %v511_v51 }
 0x139   :  { %546 = vst [vmem:[#allocation5 + $0x30] sm:$0xff] %v530_v61  ;;  %554 = vst [vmem:[#allocation5 + $0x70] sm:$0xff] %v538_v0 }
 0x13a   :  { %547 = vst [vmem:[#allocation5 + $0x38] sm:$0xff] %v531_v1  ;;  %555 = vst [vmem:[#allocation5 + $0x78] sm:$0xff] %v539_v2 }
 0x13b   :  { %748 = shalt.err (!%p745_p12)
}
 0x13c   :  { %s749_s11 = scalar_lea.hbm %s902_s4, 2048 }
 0x13d   :  { %p750_p13 = scmp.ne.s32.totalorder %s902_s4, %s749_s11  ;;  %p753_p0 = scmp.lt.u32.totalorder %s749_s11, %s902_s4 }
 0x13f   :  { %p755_p1 = pnand %p753_p0, %p750_p13 }
 0x141   :  { %758 = shalt.err (!%p755_p1)
}
 0x142   :  { %s768_s16 = smov 256   ;;  %s769_s17 = smov 16  }
 0x143   :  { %567 = dma.vmem_to_hbm [thread:$0]  %s562_s3, 2048, %s902_s4, [#allocation4], %s768_s16, %s768_s16, %s769_s17  }
 0x144   :  { %761 = dma.done.wait [#allocation4], 2048  }
 0x145   :  { %762 = vsyncadd [#allocation4], 4294965248 }
 0x146   :  { %571 = vsyncpa [#allocation3], 1 }
 0x147   :  { %572 = vsyncpa [#allocation4], 1 }

</bundles_post_ra>
